<compile_context>
chip_gen: v5e
topology: v5e:2x2
jax: 0.10.0
libtpu: 0.0.40
codegen_flags: <defaults>
</compile_context>

<pallas_src>
import jax
import jax.numpy as jnp
from jax.experimental import pallas as pl
from jax.experimental.pallas import tpu as pltpu


def _copy_kernel(x_ref, o_ref):
    # Whole-tile pass-through: pure DMA in / DMA out, no VPU work.
    o_ref[...] = x_ref[...]


def _sublane_for(dtype) -> int:
    itemsize = jnp.dtype(dtype).itemsize
    return {4: 8, 2: 16, 1: 32}.get(itemsize, 8)


def _chip_budget():
    """(max_block_bytes, vmem_limit_bytes) tuned per TPU generation."""
    kind = ""
    try:
        kind = jax.devices()[0].device_kind.lower()
    except Exception:  # pragma: no cover - defensive; default budget below
        pass
    if "v5" in kind:
        # v5e: 16 MiB scoped-VMEM default; 2 MiB blocks already amortize the
        # ~0.35 us per-step overhead at ~820 GB/s HBM.  Don't ask for more
        # scoped VMEM than the default.
        return 2 << 20, 16 << 20
    if "v6" in kind:
        # v6e: 128 MiB physical VMEM; measured copy roofline keeps improving
        # up to multi-MiB tiles, so allow bigger blocks + more scoped VMEM.
        return 6 << 20, 48 << 20
    # v7x (and unknown): 64 MiB physical / 32 MiB scoped default; 4 MiB
    # blocks keep 4 buffers at 16 MiB while cutting per-step overhead share.
    return 4 << 20, 32 << 20


def _identity_2d(x2d: jax.Array) -> jax.Array:
    """Tiled, lane-dense identity copy of a (rows, 128k)-shaped array.

    Rows must be a multiple of the dtype's sublane count and cols a multiple
    of 128 (callers guarantee this by padding).  Input buffer is aliased to
    the output (saves the second HBM allocation, NOT the write-back DMA).
    """
    rows, cols = x2d.shape
    itemsize = jnp.dtype(x2d.dtype).itemsize
    sublane = _sublane_for(x2d.dtype)
    max_block_bytes, vmem_limit = _chip_budget()

    target_rows = max(sublane, max_block_bytes // max(1, cols * itemsize))
    tr = min(rows, target_rows)
    tr = max(sublane, (tr // sublane) * sublane)
    # Give a 2-TC chip (v7x) at least two grid steps so both cores get work.
    if pl.cdiv(rows, tr) < 2 and rows >= 2 * sublane:
        tr = max(sublane, ((rows // 2) // sublane) * sublane)
    grid = (pl.cdiv(rows, tr),)

    return pl.pallas_call(
        _copy_kernel,
        out_shape=jax.ShapeDtypeStruct((rows, cols), x2d.dtype),
        grid=grid,
        in_specs=[pl.BlockSpec((tr, cols), lambda i: (i, 0))],
        out_specs=pl.BlockSpec((tr, cols), lambda i: (i, 0)),
        input_output_aliases={0: 0},
        compiler_params=pltpu.CompilerParams(
            # "parallel": shards the row-tile axis across v7x's 2 TensorCores;
            # neutral on single-TC v5e/v6e.
            dimension_semantics=("parallel",),
            vmem_limit_bytes=vmem_limit,
        ),
    )(x2d)


def identity_pallas(x: jax.Array, *, force_kernel: bool = False) -> jax.Array:
    """Identity pass-through.

    Default: returns `x` directly — the reference module has no compute, so
    running any kernel would only burn ~2x array bytes of HBM bandwidth.
    With force_kernel=True (smoke test), runs a tiled, lane-dense Pallas copy.
    """
    if not force_kernel:
        return x
    if x.ndim == 0 or x.size == 0:
        return x

    total = int(x.size)
    sublane = _sublane_for(x.dtype)
    lanes = 128
    chunk = sublane * lanes

    # Lane-dense flattening: pad the flat array to a multiple of
    # (sublane * 128) so every block is full-lane and sublane-aligned.
    padded = ((total + chunk - 1) // chunk) * chunk
    flat = x.reshape(-1)
    if padded != total:
        flat = jnp.pad(flat, (0, padded - total))
    x2d = flat.reshape(padded // lanes, lanes)

    y2d = _identity_2d(x2d)
    return y2d.reshape(-1)[:total].reshape(x.shape)


class PPONet:
    """JAX port of the (empty) PyTorch ppo_net module."""

    def __init__(self, n_f: int, n_a: int):
        # Reference __init__ registers no parameters; nothing to initialize.
        self.n_f = n_f
        self.n_a = n_a

    def forward(self):
        # Reference forward(self): `pass`  -> returns None.
        return None

    __call__ = forward


if __name__ == "__main__":
    # Exact forward semantics: ppo_net takes no tensors and returns None.
    net = PPONet(n_f=4, n_a=2)
    result = net()
    assert result is None

    key = jax.random.PRNGKey(0)
    k1, k2, k3 = jax.random.split(key, 3)

    # Fast path (production): no kernel, no HBM round trip.
    x_fast = jax.random.normal(k1, (256, 128), dtype=jnp.float32)
    y_fast = identity_pallas(x_fast)
    jax.block_until_ready(y_fast)
    assert y_fast.shape == x_fast.shape and jnp.allclose(y_fast, x_fast)

    # Smoke test 1: aligned 2-D input -> tiled lane-dense aliased copy.
    x = jax.random.normal(k2, (256, 128), dtype=jnp.float32)
    y = identity_pallas(x, force_kernel=True)
    jax.block_until_ready(y)
    assert y.shape == x.shape and jnp.allclose(y, x)

    # Smoke test 2: small NCHW input -> flattened + padded to (rows, 128),
    # fully tiled full-lane copy (no masked stores, no single giant block).
    x_nchw = jax.random.normal(k3, (2, 4, 16, 16), dtype=jnp.float32)
    y_nchw = identity_pallas(x_nchw, force_kernel=True)
    jax.block_until_ready(y_nchw)
    assert y_nchw.shape == x_nchw.shape and jnp.allclose(y_nchw, x_nchw)

    print("KERNEL_OK")
</pallas_src>

<mosaic_0001>
module attributes {stable_mosaic.version = 11 : i64} {
  func.func @_copy_kernel(%arg0: i32, %arg1: memref<128x128xf32, #tpu.memory_space<vmem>>, %arg2: memref<128x128xf32, #tpu.memory_space<vmem>>) attributes {dimension_semantics = [#tpu.dimension_semantics<parallel>], iteration_bounds = array<i64: 2>, scalar_prefetch = 0 : i64, scratch_operands = 0 : i64, tpu.core_type = #tpu.core_type<tc>, window_params = [{transform_indices = @transform_0, window_bounds = array<i64: 128, 128>}, {transform_indices = @transform_1, window_bounds = array<i64: 128, 128>}]} {
    %c0 = arith.constant 0 : index
    %c0_0 = arith.constant 0 : index
    %0 = vector.load %arg1[%c0, %c0_0] : memref<128x128xf32, #tpu.memory_space<vmem>>, vector<128x128xf32>
    %c0_1 = arith.constant 0 : index
    %c0_2 = arith.constant 0 : index
    %1 = vector.load %arg2[%c0_1, %c0_2] : memref<128x128xf32, #tpu.memory_space<vmem>>, vector<128x128xf32>
    tpu.vector_store %arg2[%c0_1, %c0_2], %0 {strides = array<i32>} : memref<128x128xf32, #tpu.memory_space<vmem>>, vector<128x128xf32>,
    return
  }
  func.func @transform_0(%arg0: i32) -> (i32, i32) {
    %c0_i32 = arith.constant 0 : i32
    %c0_i32_0 = arith.constant 0 : i32
    return %arg0, %c0_i32 : i32, i32
  }
  func.func @transform_1(%arg0: i32) -> (i32, i32) {
    %c0_i32 = arith.constant 0 : i32
    %c0_i32_0 = arith.constant 0 : i32
    return %arg0, %c0_i32 : i32, i32
  }
}

</mosaic_0001>

<bundles_post_ra>
// kernel: tpu_custom_call.1
= control target key start
LH: loop header
LB: loop body
LE: loop exit
PB: predicated region body
PF: predicated region fallthrough
CT: control target
= control target key end

     0   :  { %6 = vsyncpa [#allocation3], 0  ;;  %s602_s0 = inlined_call_operand.hbm [shape: f32[256,128], index: 0, kind: input, shape index: {}, may-alias: {0,1}]   ;;  %s603_s1 = inlined_call_operand.hbm [shape: f32[256,128], index: 1, kind: output, shape index: {}, may-alias: {0,1}]  }
   0x1   :  { %8 = vsyncpa [#allocation3 + $0x1], 0 }
   0x2   :  { %9 = vsyncpa [#allocation4], 0 }
   0x3   :  { %11 = vsyncpa [#allocation4 + $0x1], 0  ;;  %s438_s6 = smov 0   ;;  %s440_s7 = smov 0  }
   0x4   :  { %s442_s8 = smov 0   ;;  %s444_s9 = smov 0  }
   0x5 LB: > { %s459_s10 = sadd.s32 4294967295, %s422_s9   ;;  %s260_s11 = sadd.s32 4294967294, %s422_s9   ;;  %s422_s9 = sphi %s444_s9, %s613_s9   ;;  %s418_s8 = sphi %s442_s8, %s612_s8   ;;  %s414_s7 = sphi %s440_s7, %s611_s7   ;;  %s410_s6 = sphi %s438_s6, %s610_s6  }
   0x6   : > { %s463_s12 = sadd.s32 1, %s422_s9   ;;  %s24_s13 = sadd.s32 1, %s418_s8 }
   0x7   : > { %s21_s14 = ssub.s32 %s422_s9, %s463_s12  ;;  %p31_p0 = scmp.ne.s32.totalorder %s418_s8, %s414_s7 }
   0x8   : > { %p22_p1 = scmp.eq.s32.totalorder %s21_s14, 0  ;;  %p32_p2 = scmp.eq.s32.totalorder %s422_s9, 0 }
   0x9   : > { %p37_p3 = scmp.ne.s32.totalorder %s414_s7, %s410_s6  ;;  %p38_p4 = scmp.eq.s32.totalorder %s459_s10, 0 }
   0xa   : > { %s475_s15 = scalar_select %p22_p1, %s418_s8, %s24_s13  }
   0xb   : > { %p477_p5 = por %p32_p2, %p31_p0  ;;  %p481_p6 = por %p38_p4, %p37_p3 }
   0xc   : > { %p61_p7 = scmp.eq.s32.totalorder %s459_s10, 1  ;;  %p67_p8 = scmp.eq.s32.totalorder %s260_s11, 1 }
   0xd   : > { %p288_p10 = scmp.lt.s32.totalorder %s422_s9, 2  ;;  %s87_s20 = sand.u32 1, %s418_s8  }
   0xe   : > { %p488_p11 = por %p61_p7, %p31_p0  ;;  %p492_p12 = por %p67_p8, %p37_p3 }
   0xf   : > { %s274_s21 = sshll.u32 %s422_s9, 7  ;;  %s263_s22 = sshll.u32 %s87_s20, 7 }
  0x10   : > { %s96_s25 = scalar_lea.hbm %s602_s0, %s274_s21  ;;  %s91_s27 = scalar_lea.vmem [#allocation2], %s263_s22 }
  0x11   : > { %s97_s26 = sshll.u32 %s96_s25, 4  ;;  %s99_s28 = sshll.u32 %s91_s27, 4  ;;  %s98_s26 = int_to_ptr.hbm [resolvable:$true] %s97_s26  ;;  %s100_s28 = int_to_ptr.vmem [resolvable:$true] %s99_s28 }
  0x12   : > { %p503_p13 = pnand %p288_p10, %p477_p5  ;;  %p266_p0 = scmp.ge.s32.totalorder %s422_s9, 1 }
  0x13   : > { %p107_p1 = scmp.lt.s32.totalorder %s422_s9, 3  ;;  %s88_s30 = scalar_lea.sflag [#allocation3], %s87_s20 }
  0x14   : > { %s326_s2 = sshra.s32 %s98_s26, 4  ;;  %p330_p3 = pneg %p503_p13  ;;  %s327_s2 = int_to_ptr.hbm [resolvable:$true] %s326_s2 }
  0x15   : > { %s328_s3 = scalar_lea.hbm %s327_s2, 128  ;;  %s333_s11 = scalar_lea.hbm %s602_s0, 256 }
  0x16   : > { %p329_p2 = scmp.ne.s32.totalorder %s327_s2, %s328_s3  ;;  %p334_p5 = scmp.lt.s32.totalorder %s327_s2, %s602_s0 }
  0x17   : > { %p335_p8 = scmp.lt.s32.totalorder %s333_s11, %s328_s3 }
  0x18   : > { %p331_p4 = pnand %p330_p3, %p329_p2 }
  0x19   : > { %p336_p10 = por %p335_p8, %p334_p5 }
  0x1a   : > { %p332_p7 = pneg %p331_p4 }
  0x1c   : > { %p337_p9 = pnand %p336_p10, %p332_p7 }
  0x1e   : > { %340 = shalt.err (!%p337_p9)
}
  0x1f   : > { %s424_s16 = smov 128   ;;  %s425_s20 = smov 8  }
  0x20   : > { %283 = dma.hbm_to_vmem [thread:$0]  (!%p503_p13), %s98_s26, 2048, %s100_s28, %s88_s30, %s424_s16, %s424_s16, %s425_s20  }
  0x21   : > { %p108_p2 = pnand %p266_p0, %p107_p1 }
  0x22   : > { %s524_s21 = sand.u32 (!%p108_p2), 1, %s414_s7  }
  0x23   : > { %111 = sbr.rel (%p108_p2) target bundleno = 61 (0x3d), region = 24  ;;  %s267_s22 = sshll.u32 (!%p108_p2), %s524_s21, 7 }
  0x24   : > { %s114_s23 = scalar_lea.sflag (!%p108_p2), [#allocation3], %s524_s21  ;;  %s528_s24 = scalar_lea.vmem (!%p108_p2), [#allocation2], %s267_s22 }
  0x28   : > { %401 = dma.done.wait (%p481_p6), %s114_s23, 2048  }
  0x29   : > { %403 = vsyncadd (%p481_p6), %s114_s23, 4294965248  ;;  %v139_v0 = vld [vmem:[%s528_s24] sm:$0xff]  ;;  %v140_v1 = vld [vmem:[%s528_s24 + $0x8] sm:$0xff]  ;;  %s537_s25 = scalar_lea.vmem [#allocation5], %s267_s22  ;;  %s275_s17 = sshll.u32 %s459_s10, 7 }
  0x2a   : > { %v141_v2 = vld [vmem:[%s528_s24 + $0x10] sm:$0xff]  ;;  %155 = vst [vmem:[%s537_s25] sm:$0xff] %v139_v0  ;;  %v142_v3 = vld [vmem:[%s528_s24 + $0x18] sm:$0xff]  ;;  %v143_v4 = vld [vmem:[%s528_s24 + $0x20] sm:$0xff]  ;;  %s183_s28 = scalar_lea.hbm %s603_s1, %s275_s17  ;;  %s184_s10 = sshll.u32 %s537_s25, 4  ;;  %s185_s10 = int_to_ptr.vmem [resolvable:$true] %s184_s10 }
  0x2b   : > { %156 = vst [vmem:[%s537_s25 + $0x8] sm:$0xff] %v140_v1  ;;  %v144_v5 = vld [vmem:[%s528_s24 + $0x28] sm:$0xff]  ;;  %v145_v6 = vld [vmem:[%s528_s24 + $0x30] sm:$0xff]  ;;  %v146_v7 = vld [vmem:[%s528_s24 + $0x38] sm:$0xff]  ;;  %s186_s29 = sshll.u32 %s183_s28, 4  ;;  %s172_s30 = scalar_lea.sflag [#allocation4], %s524_s21  ;;  %s187_s29 = int_to_ptr.hbm [resolvable:$true] %s186_s29 }
  0x2c   : > { %157 = vst [vmem:[%s537_s25 + $0x10] sm:$0xff] %v141_v2  ;;  %v147_v8 = vld [vmem:[%s528_s24 + $0x40] sm:$0xff]  ;;  %v148_v9 = vld [vmem:[%s528_s24 + $0x48] sm:$0xff]  ;;  %v149_v10 = vld [vmem:[%s528_s24 + $0x50] sm:$0xff]  ;;  %s370_s2 = sshra.s32 %s187_s29, 4  ;;  %s376_s11 = scalar_lea.hbm %s603_s1, 256  ;;  %s371_s2 = int_to_ptr.hbm [resolvable:$true] %s370_s2 }
  0x2d   : > { %158 = vst [vmem:[%s537_s25 + $0x18] sm:$0xff] %v142_v3  ;;  %v150_v11 = vld [vmem:[%s528_s24 + $0x58] sm:$0xff]  ;;  %v151_v12 = vld [vmem:[%s528_s24 + $0x60] sm:$0xff]  ;;  %v152_v13 = vld [vmem:[%s528_s24 + $0x68] sm:$0xff]  ;;  %s372_s3 = scalar_lea.hbm %s371_s2, 128  ;;  %p377_p0 = scmp.lt.s32.totalorder %s371_s2, %s603_s1 }
  0x2e   : > { %159 = vst [vmem:[%s537_s25 + $0x20] sm:$0xff] %v143_v4  ;;  %v153_v14 = vld [vmem:[%s528_s24 + $0x70] sm:$0xff]  ;;  %v154_v15 = vld [vmem:[%s528_s24 + $0x78] sm:$0xff]  ;;  %p373_p6 = scmp.ne.s32.totalorder %s371_s2, %s372_s3  ;;  %p378_p1 = scmp.lt.s32.totalorder %s376_s11, %s372_s3 }
  0x2f   : > { %160 = vst [vmem:[%s537_s25 + $0x28] sm:$0xff] %v144_v5 }
  0x30   : > { %161 = vst [vmem:[%s537_s25 + $0x30] sm:$0xff] %v145_v6  ;;  %p374_p9 = pnand %p373_p6, %p488_p11  ;;  %p379_p3 = por %p378_p1, %p377_p0 }
  0x31   : > { %162 = vst [vmem:[%s537_s25 + $0x38] sm:$0xff] %v146_v7 }
  0x32   : > { %163 = vst [vmem:[%s537_s25 + $0x40] sm:$0xff] %v147_v8  ;;  %p375_p13 = pneg %p374_p9 }
  0x33   : > { %164 = vst [vmem:[%s537_s25 + $0x48] sm:$0xff] %v148_v9 }
  0x34   : > { %165 = vst [vmem:[%s537_s25 + $0x50] sm:$0xff] %v149_v10  ;;  %p380_p4 = pnand %p379_p3, %p375_p13 }
  0x35   : > { %166 = vst [vmem:[%s537_s25 + $0x58] sm:$0xff] %v150_v11 }
  0x36   : > { %167 = vst [vmem:[%s537_s25 + $0x60] sm:$0xff] %v151_v12 }
  0x37   : > { %168 = vst [vmem:[%s537_s25 + $0x68] sm:$0xff] %v152_v13 }
  0x38   : > { %169 = vst [vmem:[%s537_s25 + $0x70] sm:$0xff] %v153_v14 }
  0x39   : > { %170 = vst [vmem:[%s537_s25 + $0x78] sm:$0xff] %v154_v15 }
  0x3a   : > { %383 = shalt.err (!%p380_p4)
}
  0x3b   : > { %s426_s16 = smov 128   ;;  %s427_s20 = smov 8  }
  0x3c   : > { %278 = dma.vmem_to_hbm [thread:$0]  (%p488_p11), %s185_s10, 2048, %s187_s29, %s172_s30, %s426_s16, %s426_s16, %s427_s20  }
  0x3d PF: > { %s201_s21 = sand.u32 1, %s410_s6   ;;  %p609_p7 = scmp.ge.s32.totalorder %s422_s9, 2 }
  0x3e   : > { %s202_s22 = scalar_lea.sflag [#allocation4], %s201_s21 }
  0x3f   : > { %p285_p5 = pnand %p609_p7, %p492_p12 }
  0x41   : > { %p286_p8 = pneg %p285_p5 }
  0x43   : > { %405 = dma.done.wait (%p286_p8), %s202_s22, 2048  }
  0x44   : > { %407 = vsyncadd (%p286_p8), %s202_s22, 4294965248  ;;  %p14_p10 = scmp.ge.s32.totalorder %s463_s12, 4   ;;  %s610_s6 = smov %s414_s7 }
  0x45   : > { %s611_s7 = smov %s418_s8  ;;  %s612_s8 = smov %s475_s15 }
  0x46   : > { %s613_s9 = smov %s463_s12  ;;  %16 = sbr.rel (!%p14_p10) target bundleno = 5 (0x5), region = 69 }
  0x4b   :  { %208 = vsyncpa [#allocation3], 1 }
  0x4c   :  { %210 = vsyncpa [#allocation3 + $0x1], 1 }
  0x4d   :  { %211 = vsyncpa [#allocation4], 1 }
  0x4e   :  { %213 = vsyncpa [#allocation4 + $0x1], 1 }

</bundles_post_ra>
